<compile_context>
chip_gen: v7x
topology: tpu7x:2x2x1
jax: 0.10.0
libtpu: 0.0.40
codegen_flags: <defaults>
</compile_context>

<pallas_src>
import functools

import jax
import jax.numpy as jnp
from jax import lax
from jax.experimental import pallas as pl
from jax.experimental.pallas import tpu as pltpu


# ----------------------------------------------------------------------------
# hardware-aware caps
# ----------------------------------------------------------------------------
@functools.lru_cache(maxsize=None)
def _hw_caps():
    """(vmem_limit_bytes, tm_cap, tn_cap): wide on 128 MiB-VMEM parts
    (v5e/v6e), tight on 64 MiB-VMEM parts (v7x)."""
    try:
        vmem = pltpu.get_tpu_info().vmem_capacity_bytes
    except Exception:
        vmem = 64 << 20
    if vmem >= (96 << 20):
        return 96 << 20, 1024, 512
    return 48 << 20, 256, 256


def fold_bn(gamma, beta, mean, var, eps=1e-5):
    scale = gamma / jnp.sqrt(var + eps)
    bias = beta - mean * scale
    return scale, bias


# ----------------------------------------------------------------------------
# Pallas kernels: GEMM (+ optional second GEMM / residual) -> bias -> ReLU
#   (BN scale already folded into the weight columns in glue)
# ----------------------------------------------------------------------------
def _gemm_bias_kernel(a_ref, w_ref, b_ref, o_ref, *, relu):
    acc = jnp.dot(a_ref[...], w_ref[...], preferred_element_type=jnp.float32)
    acc = acc + b_ref[...].astype(jnp.float32)
    if relu:
        acc = jnp.maximum(acc, 0.0)
    o_ref[...] = acc.astype(o_ref.dtype)


def _gemm_bias_res_relu_kernel(a_ref, w_ref, b_ref, r_ref, o_ref):
    acc = jnp.dot(a_ref[...], w_ref[...], preferred_element_type=jnp.float32)
    acc = acc + b_ref[...].astype(jnp.float32) + r_ref[...].astype(jnp.float32)
    o_ref[...] = jnp.maximum(acc, 0.0).astype(o_ref.dtype)


def _dual_gemm_bias_relu_kernel(a_ref, w_ref, b_ref, a2_ref, w2_ref, o_ref):
    acc = jnp.dot(a_ref[...], w_ref[...], preferred_element_type=jnp.float32)
    acc = acc + jnp.dot(a2_ref[...], w2_ref[...],
                        preferred_element_type=jnp.float32)
    acc = acc + b_ref[...].astype(jnp.float32)
    o_ref[...] = jnp.maximum(acc, 0.0).astype(o_ref.dtype)


def matmul_bias(a, w, bias, *, relu=True, residual=None, a2=None, w2=None,
                out_dtype=jnp.float32):
    """out = relu_or_id(a @ w [+ a2 @ w2] + bias [+ residual]).

    bf16 GEMM operands, f32 MXU accumulation + f32 epilogue.  2-D grid over
    (M rows, Nout cols); ragged edge tiles are handled by Pallas partial-block
    masking (no host-side row padding / un-padding passes)."""
    vmem_limit, tm_cap, tn_cap = _hw_caps()
    M, K = a.shape
    Nout = w.shape[1]
    tm = M if M <= tm_cap else tm_cap          # caps are 16-aligned
    tn = Nout if Nout <= tn_cap else tn_cap    # caps are 128-aligned
    gm, gn = pl.cdiv(M, tm), pl.cdiv(Nout, tn)

    bias2 = bias.reshape(1, Nout).astype(jnp.float32)

    in_specs = [pl.BlockSpec((tm, K), lambda i, j: (i, 0)),
                pl.BlockSpec((K, tn), lambda i, j: (0, j)),
                pl.BlockSpec((1, tn), lambda i, j: (0, j))]
    args = [a, w, bias2]

    flops = 2 * M * K * Nout
    bytes_acc = (a.size * a.dtype.itemsize + w.size * w.dtype.itemsize
                 + bias2.size * 4 + M * Nout * jnp.dtype(out_dtype).itemsize)

    if a2 is not None:
        K2 = w2.shape[0]
        in_specs += [pl.BlockSpec((tm, K2), lambda i, j: (i, 0)),
                     pl.BlockSpec((K2, tn), lambda i, j: (0, j))]
        args += [a2, w2]
        kernel = _dual_gemm_bias_relu_kernel
        flops += 2 * M * K2 * Nout
        bytes_acc += a2.size * a2.dtype.itemsize + w2.size * w2.dtype.itemsize
    elif residual is not None:
        in_specs.append(pl.BlockSpec((tm, tn), lambda i, j: (i, j)))
        args.append(residual)
        kernel = _gemm_bias_res_relu_kernel
        bytes_acc += residual.size * residual.dtype.itemsize
    else:
        kernel = functools.partial(_gemm_bias_kernel, relu=relu)

    return pl.pallas_call(
        kernel,
        out_shape=jax.ShapeDtypeStruct((M, Nout), out_dtype),
        grid=(gm, gn),
        in_specs=in_specs,
        out_specs=pl.BlockSpec((tm, tn), lambda i, j: (i, j)),
        compiler_params=pltpu.CompilerParams(
            dimension_semantics=("parallel", "parallel"),
            vmem_limit_bytes=vmem_limit),
        cost_estimate=pl.CostEstimate(flops=int(flops), transcendentals=0,
                                      bytes_accessed=int(bytes_acc)),
    )(*args)


# ----------------------------------------------------------------------------
# Pallas kernel: fused 3x3 conv (stride s, pad 1) + BN bias + ReLU
#   9 taps accumulated as (tr*Wu, Cin) x (Cin, Cout) GEMMs straight out of
#   flattened phase slabs resident in VMEM; one lane-dense store per tile.
# ----------------------------------------------------------------------------
def _pick_conv_row_tile(Ho, Wu, Cout, acc_budget=128 * 1024):
    """Largest divisor tr of Ho whose f32 accumulator (tr*Wu x Cout) fits the
    budget and whose output block sublane dim (tr*Wu) is 16-aligned; fall back
    to the full height (a full-dim block is always layout-legal)."""
    limit = max(1, acc_budget // max(1, Wu * Cout * 4))
    for t in range(min(Ho, limit), 0, -1):
        if Ho % t == 0 and (t * Wu) % 16 == 0:
            return t
    return Ho


def _conv3x3_kernel(*refs, stride, tr, Wu, Cout):
    s = stride
    nph = s * s
    ph_refs = refs[:nph]           # each (Hu*Wu, Cin) bf16, full slab resident
    w_ref = refs[nph]              # (9, Cin, Cout) bf16, BN scale pre-folded
    b_ref = refs[nph + 1]          # (1, Cout) f32
    o_ref = refs[nph + 2]          # (tr*Wu, Cout)

    r0 = pl.program_id(1) * tr
    L = tr * Wu
    bias = b_ref[...].astype(jnp.float32)

    acc = jnp.zeros((L, Cout), jnp.float32)
    for t in range(9):             # static unroll over taps only
        dh, dw = t // 3, t % 3
        ph = ph_refs[(dh % s) * s + (dw % s)]
        start = (r0 + dh // s) * Wu + (dw // s)
        acc = acc + jnp.dot(ph[pl.ds(start, L), :], w_ref[t],
                            preferred_element_type=jnp.float32)
    o_ref[...] = jnp.maximum(acc + bias, 0.0).astype(o_ref.dtype)


def conv3x3_bn_relu(x_nhwc, w_hwio_eff, bias, *, stride):
    """3x3 conv, stride s, pad 1, + folded-BN bias + ReLU.  x / w are bf16."""
    N, H, W, Cin = x_nhwc.shape
    Cout = w_hwio_eff.shape[-1]
    s = stride
    Ho = (H - 1) // s + 1
    Wo = (W - 1) // s + 1
    R = 2 // s                     # per-phase halo (2 for s=1, 1 for s=2)
    Wu = Wo + R                    # common phase / output "flat" row width
    Hu = Ho + R + 1                # +1 slack row so every tap reads tr*Wu rows

    vmem_limit, _, _ = _hw_caps()

    # Pad once so every (row, col) phase slab is exactly (Hu, Wu).
    xp = jnp.pad(x_nhwc, ((0, 0),
                          (1, s * Hu - H - 1),
                          (1, s * Wu - W - 1),
                          (0, 0)))
    # s*s phase slabs, flattened to 2-D rows (total bytes == padded input; one
    # glue pass).  Inside the kernel every tap is then a unit-stride window.
    phases = [xp[:, a::s, b::s, :].reshape(N, Hu * Wu, Cin)
              for a in range(s) for b in range(s)]
    w_taps = w_hwio_eff.reshape(9, Cin, Cout)
    bias2 = bias.reshape(1, Cout).astype(jnp.float32)

    tr = _pick_conv_row_tile(Ho, Wu, Cout)
    n_rb = Ho // tr

    in_specs = [pl.BlockSpec((None, Hu * Wu, Cin), lambda n, rb: (n, 0, 0))
                for _ in range(s * s)]
    in_specs += [pl.BlockSpec((9, Cin, Cout), lambda n, rb: (0, 0, 0)),
                 pl.BlockSpec((1, Cout), lambda n, rb: (0, 0))]
    out_spec = pl.BlockSpec((None, tr * Wu, Cout), lambda n, rb: (n, rb, 0))

    flops = 2 * N * Ho * Wu * 9 * Cin * Cout
    bytes_acc = (sum(p.size * p.dtype.itemsize for p in phases)
                 + w_taps.size * 2 + bias2.size * 4 + N * Ho * Wu * Cout * 2)

    out_flat = pl.pallas_call(
        functools.partial(_conv3x3_kernel, stride=s, tr=tr, Wu=Wu, Cout=Cout),
        out_shape=jax.ShapeDtypeStruct((N, Ho * Wu, Cout), jnp.bfloat16),
        grid=(N, n_rb),
        in_specs=in_specs,
        out_specs=out_spec,
        compiler_params=pltpu.CompilerParams(
            dimension_semantics=("parallel", "parallel"),
            vmem_limit_bytes=vmem_limit),
        cost_estimate=pl.CostEstimate(flops=int(flops), transcendentals=0,
                                      bytes_accessed=int(bytes_acc)),
    )(*phases, w_taps, bias2)

    # Drop the R throw-away columns per row (fused by XLA into the consumer).
    return out_flat.reshape(N, Ho, Wu, Cout)[:, :, :Wo, :]


# ----------------------------------------------------------------------------
# Bottleneck block
# ----------------------------------------------------------------------------
class BottleneckPallas:
    expansion = 4

    def __init__(self, key, in_planes, planes, stride=1):
        self.in_planes, self.planes, self.stride = in_planes, planes, stride
        out_planes = self.expansion * planes
        ks = jax.random.split(key, 8)

        def w_init(k, shape):
            return jax.random.normal(k, shape, jnp.float32) * 0.1

        def bn_params(kb, c):
            k1, k2, k3, k4 = jax.random.split(kb, 4)
            gamma = 1.0 + 0.1 * jax.random.normal(k1, (c,), jnp.float32)
            beta = 0.1 * jax.random.normal(k2, (c,), jnp.float32)
            mean = 0.1 * jax.random.normal(k3, (c,), jnp.float32)
            var = 1.0 + 0.1 * jax.random.uniform(k4, (c,), jnp.float32)
            return gamma, beta, mean, var

        self.w1 = w_init(ks[0], (in_planes, planes))                 # 1x1
        self.w2 = w_init(ks[1], (3, 3, planes, planes))              # 3x3 HWIO
        self.w3 = w_init(ks[2], (planes, out_planes))                # 1x1
        self.bn1 = bn_params(ks[3], planes)
        self.bn2 = bn_params(ks[4], planes)
        self.bn3 = bn_params(ks[5], out_planes)

        self.has_proj = (stride != 1) or (in_planes != out_planes)
        if self.has_proj:
            self.ws = w_init(ks[6], (in_planes, out_planes))         # 1x1, stride s
            self.bns = bn_params(ks[7], out_planes)

    # folded, bf16 weight views (BN scale folded into output channels)
    def _effective_params(self):
        s1, b1 = fold_bn(*self.bn1)
        s2, b2 = fold_bn(*self.bn2)
        s3, b3 = fold_bn(*self.bn3)
        w1e = (self.w1 * s1[None, :]).astype(jnp.bfloat16)
        w2e = (self.w2 * s2[None, None, None, :]).astype(jnp.bfloat16)
        w3e = (self.w3 * s3[None, :]).astype(jnp.bfloat16)
        if self.has_proj:
            ss, bs = fold_bn(*self.bns)
            wse = (self.ws * ss[None, :]).astype(jnp.bfloat16)
        else:
            wse, bs = None, None
        return (w1e, b1), (w2e, b2), (w3e, b3), (wse, bs)

    # ---- forward using Pallas kernels --------------------------------------
    def __call__(self, x_nchw):
        x = jnp.transpose(x_nchw, (0, 2, 3, 1)).astype(jnp.float32)  # NHWC
        N, H, W, Cin = x.shape
        s = self.stride
        planes = self.planes
        out_planes = self.expansion * planes
        Ho = (H - 1) // s + 1
        Wo = (W - 1) // s + 1

        (w1e, b1), (w2e, b2), (w3e, b3), (wse, bs) = self._effective_params()
        xb = x.astype(jnp.bfloat16)

        # stage 1: 1x1 conv -> BN -> ReLU  (GEMM + bias fused, bf16 out)
        a1 = xb.reshape(N * H * W, Cin)
        o1 = matmul_bias(a1, w1e, b1, relu=True, out_dtype=jnp.bfloat16)
        o1 = o1.reshape(N, H, W, planes)

        # stage 2: 3x3 conv (stride s, pad 1) -> BN -> ReLU  (fused, no im2col)
        o2 = conv3x3_bn_relu(o1, w2e, b2, stride=s)          # (N,Ho,Wo,planes)

        # stage 3: 1x1 conv -> BN -> (+ shortcut) -> ReLU, fully fused
        a3 = o2.reshape(N * Ho * Wo, planes)
        # TODO(synk): feed the strided shortcut via BlockSpec index_map instead
        #             of this glue slice when stride > 1.
        xs = xb[:, ::s, ::s, :].reshape(N * Ho * Wo, Cin)
        if self.has_proj:
            o3 = matmul_bias(a3, w3e, b3 + bs, a2=xs, w2=wse,
                             out_dtype=jnp.float32)
        else:
            o3 = matmul_bias(a3, w3e, b3, residual=xs, out_dtype=jnp.float32)

        out = o3.reshape(N, Ho, Wo, out_planes)
        return jnp.transpose(out, (0, 3, 1, 2))              # back to NCHW

    # ---- pure-JAX reference with matched mixed precision --------------------
    # (bf16 GEMM/conv operands, f32 accumulation & epilogue -- same numerics
    #  policy as the Pallas kernels, so differences are accumulation order only)
    def reference(self, x_nchw):
        x = jnp.transpose(x_nchw, (0, 2, 3, 1)).astype(jnp.float32)
        N, H, W, Cin = x.shape
        s = self.stride
        planes = self.planes
        out_planes = self.expansion * planes
        (w1e, b1), (w2e, b2), (w3e, b3), (wse, bs) = self._effective_params()
        xb = x.astype(jnp.bfloat16)

        # stage 1
        a1 = xb.reshape(N * H * W, Cin)
        o1 = jnp.dot(a1, w1e, preferred_element_type=jnp.float32) + b1
        o1 = jnp.maximum(o1, 0.0).astype(jnp.bfloat16).reshape(N, H, W, planes)

        # stage 2
        o2 = lax.conv_general_dilated(
            o1, w2e, window_strides=(s, s), padding=[(1, 1), (1, 1)],
            dimension_numbers=('NHWC', 'HWIO', 'NHWC'),
            preferred_element_type=jnp.float32) + b2
        o2 = jnp.maximum(o2, 0.0).astype(jnp.bfloat16)
        _, Ho, Wo, _ = o2.shape

        # stage 3 + shortcut
        a3 = o2.reshape(N * Ho * Wo, planes)
        main = jnp.dot(a3, w3e, preferred_element_type=jnp.float32) + b3
        xs = xb[:, ::s, ::s, :].reshape(N * Ho * Wo, Cin)
        if self.has_proj:
            sc = jnp.dot(xs, wse, preferred_element_type=jnp.float32) + bs
        else:
            sc = xs.astype(jnp.float32)
        out = jnp.maximum(main + sc, 0.0).reshape(N, Ho, Wo, out_planes)
        return jnp.transpose(out, (0, 3, 1, 2))


# ----------------------------------------------------------------------------
if __name__ == "__main__":
    key = jax.random.PRNGKey(0)
    kx1, kx2, kp1, kp2 = jax.random.split(key, 4)

    configs = [
        # (key_x, key_p, in_planes, planes, stride, H, W)  -- projection path
        (kx1, kp1, 4, 4, 2, 16, 16),
        # identity-shortcut path (in_planes == 4*planes, stride 1)
        (kx2, kp2, 16, 4, 1, 8, 8),
    ]

    for kx, kp, in_planes, planes, stride, H, W in configs:
        x = jax.random.normal(kx, (2, in_planes, H, W), jnp.float32)  # NCHW
        block = BottleneckPallas(kp, in_planes, planes, stride=stride)

        out = jax.block_until_ready(block(x))
        ref = jax.block_until_ready(block.reference(x))

        Ho = (H - 1) // stride + 1
        Wo = (W - 1) // stride + 1
        assert out.shape == (2, 4 * planes, Ho, Wo), out.shape
        err = float(jnp.max(jnp.abs(out - ref)))
        # bf16 MXU operands (f32 accumulation): tolerance sized for bf16 GEMMs
        assert err < 2e-2, err

    print("KERNEL_OK")
</pallas_src>

<mosaic_0001>
module attributes {stable_mosaic.version = 11 : i64} {
  func.func @_gemm_bias_kernel(%arg0: i32, %arg1: i32, %arg2: memref<256x4xbf16, #tpu.memory_space<vmem>>, %arg3: memref<4x4xbf16, #tpu.memory_space<vmem>>, %arg4: memref<1x4xf32, #tpu.memory_space<vmem>>, %arg5: memref<256x4xbf16, #tpu.memory_space<vmem>>) attributes {dimension_semantics = [#tpu.dimension_semantics<parallel>, #tpu.dimension_semantics<parallel>], iteration_bounds = array<i64: 2, 1>, scalar_prefetch = 0 : i64, scratch_operands = 0 : i64, tpu.core_type = #tpu.core_type<tc>, window_params = [{transform_indices = @transform_0, window_bounds = array<i64: 256, 4>}, {transform_indices = @transform_1, window_bounds = array<i64: 4, 4>}, {transform_indices = @transform_2, window_bounds = array<i64: 1, 4>}, {transform_indices = @transform_3, window_bounds = array<i64: 256, 4>}]} {
    %c0 = arith.constant 0 : index
    %c0_0 = arith.constant 0 : index
    %0 = vector.load %arg2[%c0, %c0_0] : memref<256x4xbf16, #tpu.memory_space<vmem>>, vector<256x4xbf16>
    %c0_1 = arith.constant 0 : index
    %c0_2 = arith.constant 0 : index
    %1 = vector.load %arg3[%c0_1, %c0_2] : memref<4x4xbf16, #tpu.memory_space<vmem>>, vector<4x4xbf16>
    %cst = arith.constant dense<0.000000e+00> : vector<256x4xf32>
    %2 = tpu.matmul %0, %1, %cst {dimension_numbers = #tpu.dot_dimension_numbers<[1], [0], [0], [1], [0, 0, 1, 1], [], []>} : vector<256x4xbf16>, vector<4x4xbf16>, vector<256x4xf32> -> vector<256x4xf32>
    %c0_3 = arith.constant 0 : index
    %c0_4 = arith.constant 0 : index
    %3 = vector.load %arg4[%c0_3, %c0_4] : memref<1x4xf32, #tpu.memory_space<vmem>>, vector<1x4xf32>
    %4 = vector.broadcast %3 : vector<1x4xf32> to vector<256x4xf32>
    %5 = arith.addf %2, %4 : vector<256x4xf32>
    %cst_5 = arith.constant 0.000000e+00 : f32
    %6 = vector.broadcast %cst_5 : f32 to vector<256x4xf32>
    %7 = arith.maximumf %5, %6 : vector<256x4xf32>
    %8 = arith.truncf %7 : vector<256x4xf32> to vector<256x4xbf16>
    %c0_6 = arith.constant 0 : index
    %c0_7 = arith.constant 0 : index
    %9 = vector.load %arg5[%c0_6, %c0_7] : memref<256x4xbf16, #tpu.memory_space<vmem>>, vector<256x4xbf16>
    tpu.vector_store %arg5[%c0_6, %c0_7], %8 {strides = array<i32>} : memref<256x4xbf16, #tpu.memory_space<vmem>>, vector<256x4xbf16>,
    return
  }
  func.func @transform_0(%arg0: i32, %arg1: i32) -> (i32, i32) {
    %c0_i32 = arith.constant 0 : i32
    %c0_i32_0 = arith.constant 0 : i32
    return %arg0, %c0_i32 : i32, i32
  }
  func.func @transform_1(%arg0: i32, %arg1: i32) -> (i32, i32) {
    %c0_i32 = arith.constant 0 : i32
    %c0_i32_0 = arith.constant 0 : i32
    return %c0_i32, %arg1 : i32, i32
  }
  func.func @transform_2(%arg0: i32, %arg1: i32) -> (i32, i32) {
    %c0_i32 = arith.constant 0 : i32
    %c0_i32_0 = arith.constant 0 : i32
    return %c0_i32, %arg1 : i32, i32
  }
  func.func @transform_3(%arg0: i32, %arg1: i32) -> (i32, i32) {
    %c0_i32 = arith.constant 0 : i32
    return %arg0, %arg1 : i32, i32
  }
}

</mosaic_0001>

<bundles_post_ra>
// kernel: tpu_custom_call.1
= control target key start
LH: loop header
LB: loop body
LE: loop exit
PB: predicated region body
PF: predicated region fallthrough
CT: control target
= control target key end

     0   :  { %s1104_s12 = smov 0   ;;  %s1106_s13 = smov 0   ;;  %s1284_s0 = inlined_call_operand.vmem [shape: bf16[512,4], index: 0, kind: input, shape index: {}]   ;;  %s1285_s1 = inlined_call_operand.vmem [shape: bf16[4,4], index: 1, kind: input, shape index: {}]   ;;  %s1286_s2 = inlined_call_operand.vmem [shape: f32[1,4], index: 2, kind: input, shape index: {}]   ;;  %s1287_s3 = inlined_call_operand.vmem [shape: bf16[512,4], index: 3, kind: output, shape index: {}]  }
   0x1   :  { %s1108_s14 = smov 0  }
   0x2 LB: > { %s25_s15 = sadd.s32 1, %s1078_s13  ;;  %p861_p0 = scmp.ge.s32.totalorder %s1082_s14, 1  ;;  %s1082_s14 = sphi %s1108_s14, %s13_s14   ;;  %s1078_s13 = sphi %s1106_s13, %s1289_s13   ;;  %s1074_s12 = sphi %s1104_s12, %s1288_s12  }
   0x3   : > { %p27_p1 = scmp.ge.s32.totalorder %s25_s15, 2  ;;  %p169_p2 = scmp.lt.s32.totalorder %s1082_s14, 3 }
   0x5   : > { %s1291_s15 = smov (%p27_p1, %s25_s15), 0  ;;  %p170_p3 = pnand %p861_p0, %p169_p2 }
   0x6   : > { %v258_v0 = vld [vmem:[%s1285_s1] sm:$0x3] (!%p170_p3)  ;;  %vm395_vm0 = vcmask (!%p170_p3), 1041408   ;;  %s862_s18 = sshll.u32 (!%p170_p3), %s1074_s12, 5  ;;  %vm346_vm1 = vcmask (!%p170_p3), 31744   ;;  %vm720_vm2 = vcmask (!%p170_p3), 27648  }
   0x7   : > { %173 = sbr.rel (%p170_p3) target bundleno = 266 (0x10a), region = 32  ;;  %1018 = vmatprep.subr.msk.bf16.mxu0 (!%p170_p3), %vm395_vm0, %v258_v0  ;;  %1019 = vmatprep.subr.msk.bf16.mxu1 (!%p170_p3), %vm395_vm0, %v258_v0  ;;  %v397_v1 = vsel (!%p170_p3), %vm395_vm0, %v258_v0, 0  ;;  %p204_p4 = scmp.lt.s32.totalorder (!%p170_p3), %s862_s18, 63  ;;  %v1170_v18 = vld [vmem:[%s1286_s2] ss:$0 sm:$0xff] (!%p170_p3) }
   0x8   : > { %983 = vmatpush3.bf16.msra.mxu0 (!%p170_p3), %v397_v1  ;;  %1017 = vmatpush3.bf16.msra.mxu1 (!%p170_p3), %v397_v1 }
   0xe   : > { %s1293_s18 = smov (!%p204_p4, %s862_s18), 63 }
   0xf   : > { %s863_s19 = sshll.u32 %s1293_s18, 2 }
  0x10   : > { %s1133_s22 = scalar_lea.vmem %s1284_s0, %s863_s19  ;;  %s1182_s27 = scalar_lea.vmem %s1287_s3, %s863_s19 }
  0x11   : > { %v1044_v2 = vld [vmem:[%s1133_s22] sm:$0xff]   ;;  %v1046_v4 = vld [vmem:[%s1133_s22 + $0x8] sm:$0xff]   ;;  %v1048_v6 = vld [vmem:[%s1133_s22 + $0x10] sm:$0xff]  }
  0x12   : > { %v1045_v3 = vld [vmem:[%s1133_s22 + $0x40] sm:$0xff]   ;;  %984 = vmatprep.mubr.msk.bf16.mxu0 %vm346_vm1, %v1044_v2  ;;  %v1047_v5 = vld [vmem:[%s1133_s22 + $0x48] sm:$0xff]   ;;  %v1049_v7 = vld [vmem:[%s1133_s22 + $0x50] sm:$0xff]  }
  0x13   : > { %1000 = vmatprep.mubr.msk.bf16.mxu1 %vm346_vm1, %v1045_v3  ;;  %985 = vmatmul.mubr.msk.bf16.vlgmr.msra.gmra.mrb[0].mxu0 %vm346_vm1, %v1046_v4  ;;  %v1050_v8 = vld [vmem:[%s1133_s22 + $0x18] sm:$0xff]   ;;  %v1052_v10 = vld [vmem:[%s1133_s22 + $0x20] sm:$0xff]   ;;  %v1054_v12 = vld [vmem:[%s1133_s22 + $0x28] sm:$0xff]  }
  0x14   : > { %1001 = vmatmul.mubr.msk.bf16.vlgmr.msra.gmra.mrb[0].mxu1 %vm346_vm1, %v1047_v5  ;;  %988 = vmatprep.mubr.msk.bf16.mxu0 %vm346_vm1, %v1048_v6  ;;  %v1051_v9 = vld [vmem:[%s1133_s22 + $0x58] sm:$0xff]   ;;  %v1053_v11 = vld [vmem:[%s1133_s22 + $0x60] sm:$0xff]   ;;  %v1055_v13 = vld [vmem:[%s1133_s22 + $0x68] sm:$0xff]  }
  0x15   : > { %1004 = vmatprep.mubr.msk.bf16.mxu1 %vm346_vm1, %v1049_v7  ;;  %v1056_v14 = vld [vmem:[%s1133_s22 + $0x30] sm:$0xff]   ;;  %v1058_v16 = vld [vmem:[%s1133_s22 + $0x38] sm:$0xff]  }
  0x16   : > { %v1057_v15 = vld [vmem:[%s1133_s22 + $0x70] sm:$0xff]   ;;  %v1059_v17 = vld [vmem:[%s1133_s22 + $0x78] sm:$0xff]  }
  0x1b   : > { %989 = vmatmul.mubr.msk.bf16.gmra.mrb[4].mxu0 %vm346_vm1, %v1050_v8 }
  0x1c   : > { %1005 = vmatmul.mubr.msk.bf16.gmra.mrb[4].mxu1 %vm346_vm1, %v1051_v9  ;;  %992 = vmatprep.mubr.msk.bf16.mxu0 %vm346_vm1, %v1052_v10 }
  0x1d   : > { %1008 = vmatprep.mubr.msk.bf16.mxu1 %vm346_vm1, %v1053_v11 }
  0x23   : > { %993 = vmatmul.mubr.msk.bf16.gmra.mrb[8].mxu0 %vm346_vm1, %v1054_v12 }
  0x24   : > { %1009 = vmatmul.mubr.msk.bf16.gmra.mrb[8].mxu1 %vm346_vm1, %v1055_v13  ;;  %996 = vmatprep.mubr.msk.bf16.mxu0 %vm346_vm1, %v1056_v14 }
  0x25   : > { %1012 = vmatprep.mubr.msk.bf16.mxu1 %vm346_vm1, %v1057_v15 }
  0x2b   : > { %997 = vmatmul.mubr.msk.bf16.gmra.mrb[12].mxu0 %vm346_vm1, %v1058_v16 }
  0x2c   : > { %1013 = vmatmul.mubr.msk.bf16.gmra.mrb[12].mxu1 %vm346_vm1, %v1059_v17 }
  0xe6   : > { %v986_v19 = vpop.f32.mrb[0].mxu0 }
  0xe7   : > { %v442_v20 = vadd.f32 %v986_v19, %v1170_v18  ;;  %v1002_v21 = vpop.f32.mrb[0].mxu1  ;;  %v433_v22 = vpop.f32.mrb[1].mxu0 }
  0xe8   : > { %v506_v23 = vadd.f32 %v1002_v21, %v1170_v18  ;;  %v434_v24 = vadd.f32 %v1170_v18, %v433_v22  ;;  %v497_v25 = vpop.f32.mrb[1].mxu1  ;;  %v987_v26 = vpop.f32.mrb[2].mxu0 }
  0xe9   : > { %v562_v27 = vmax.f32 %v442_v20, 0.0  ;;  %v498_v28 = vadd.f32 %v1170_v18, %v497_v25  ;;  %v445_v29 = vadd.f32 %v987_v26, %v1170_v18  ;;  %v1003_v30 = vpop.f32.mrb[2].mxu1  ;;  %v436_v31 = vpop.f32.mrb[3].mxu0 }
  0xea   : > { %v578_v32 = vmax.f32 %v506_v23, 0.0  ;;  %v560_v33 = vmax.f32 %v434_v24, 0.0  ;;  %v509_v34 = vadd.f32 %v1003_v30, %v1170_v18  ;;  %v437_v35 = vadd.f32 %v1170_v18, %v436_v31  ;;  %v500_v36 = vpop.f32.mrb[3].mxu1 }
  0xeb   : > { %v935_v37 = vpack.c.bf16 %v562_v27, %v562_v27  ;;  %v576_v38 = vmax.f32 %v498_v28, 0.0  ;;  %v563_v39 = vmax.f32 %v445_v29, 0.0  ;;  %v501_v40 = vadd.f32 %v1170_v18, %v500_v36 }
  0xec   : > { %v951_v41 = vpack.c.bf16 %v578_v32, %v578_v32  ;;  %v933_v42 = vpack.c.bf16 %v560_v33, %v560_v33  ;;  %v579_v43 = vmax.f32 %v509_v34, 0.0  ;;  %v561_v44 = vmax.f32 %v437_v35, 0.0 }
  0xed   : > { %723 = vst.msk [vmem:[%s1182_s27 + $0x8] sm:$0xf] %vm720_vm2, %v935_v37  ;;  %v949_v45 = vpack.c.bf16 %v576_v38, %v576_v38  ;;  %v936_v46 = vpack.c.bf16 %v563_v39, %v563_v39  ;;  %v577_v47 = vmax.f32 %v501_v40, 0.0 }
  0xee   : > { %739 = vst.msk [vmem:[%s1182_s27 + $0x48] sm:$0xf] %vm720_vm2, %v951_v41  ;;  %721 = vst.msk [vmem:[%s1182_s27] sm:$0xf] %vm720_vm2, %v933_v42  ;;  %v952_v48 = vpack.c.bf16 %v579_v43, %v579_v43  ;;  %v934_v49 = vpack.c.bf16 %v561_v44, %v561_v44  ;;  %v990_v50 = vpop.f32.mrb[4].mxu0 }
  0xef   : > { %737 = vst.msk [vmem:[%s1182_s27 + $0x40] sm:$0xf] %vm720_vm2, %v949_v45  ;;  %724 = vst.msk [vmem:[%s1182_s27 + $0xc] sm:$0xf] %vm720_vm2, %v936_v46  ;;  %v950_v51 = vpack.c.bf16 %v577_v47, %v577_v47  ;;  %v458_v52 = vadd.f32 %v990_v50, %v1170_v18  ;;  %v1006_v53 = vpop.f32.mrb[4].mxu1  ;;  %v449_v54 = vpop.f32.mrb[5].mxu0 }
  0xf0   : > { %740 = vst.msk [vmem:[%s1182_s27 + $0x4c] sm:$0xf] %vm720_vm2, %v952_v48  ;;  %722 = vst.msk [vmem:[%s1182_s27 + $0x4] sm:$0xf] %vm720_vm2, %v934_v49  ;;  %v522_v55 = vadd.f32 %v1006_v53, %v1170_v18  ;;  %v450_v56 = vadd.f32 %v1170_v18, %v449_v54  ;;  %v513_v57 = vpop.f32.mrb[5].mxu1  ;;  %v991_v58 = vpop.f32.mrb[6].mxu0 }
  0xf1   : > { %738 = vst.msk [vmem:[%s1182_s27 + $0x44] sm:$0xf] %vm720_vm2, %v950_v51  ;;  %v566_v59 = vmax.f32 %v458_v52, 0.0  ;;  %v514_v60 = vadd.f32 %v1170_v18, %v513_v57  ;;  %v461_v61 = vadd.f32 %v991_v58, %v1170_v18  ;;  %v1007_v62 = vpop.f32.mrb[6].mxu1  ;;  %v452_v63 = vpop.f32.mrb[7].mxu0 }
  0xf2   : > { %v582_v0 = vmax.f32 %v522_v55, 0.0  ;;  %v564_v1 = vmax.f32 %v450_v56, 0.0  ;;  %v525_v2 = vadd.f32 %v1007_v62, %v1170_v18  ;;  %v453_v3 = vadd.f32 %v1170_v18, %v452_v63  ;;  %v516_v4 = vpop.f32.mrb[7].mxu1 }
  0xf3   : > { %v939_v5 = vpack.c.bf16 %v566_v59, %v566_v59  ;;  %v580_v6 = vmax.f32 %v514_v60, 0.0  ;;  %v567_v7 = vmax.f32 %v461_v61, 0.0  ;;  %v517_v8 = vadd.f32 %v1170_v18, %v516_v4 }
  0xf4   : > { %v955_v9 = vpack.c.bf16 %v582_v0, %v582_v0  ;;  %v937_v10 = vpack.c.bf16 %v564_v1, %v564_v1  ;;  %v583_v11 = vmax.f32 %v525_v2, 0.0  ;;  %v565_v12 = vmax.f32 %v453_v3, 0.0 }
  0xf5   : > { %727 = vst.msk [vmem:[%s1182_s27 + $0x18] sm:$0xf] %vm720_vm2, %v939_v5  ;;  %v953_v13 = vpack.c.bf16 %v580_v6, %v580_v6  ;;  %v940_v14 = vpack.c.bf16 %v567_v7, %v567_v7  ;;  %v581_v15 = vmax.f32 %v517_v8, 0.0 }
  0xf6   : > { %743 = vst.msk [vmem:[%s1182_s27 + $0x58] sm:$0xf] %vm720_vm2, %v955_v9  ;;  %725 = vst.msk [vmem:[%s1182_s27 + $0x10] sm:$0xf] %vm720_vm2, %v937_v10  ;;  %v956_v16 = vpack.c.bf16 %v583_v11, %v583_v11  ;;  %v938_v17 = vpack.c.bf16 %v565_v12, %v565_v12  ;;  %v994_v19 = vpop.f32.mrb[8].mxu0 }
  0xf7   : > { %741 = vst.msk [vmem:[%s1182_s27 + $0x50] sm:$0xf] %vm720_vm2, %v953_v13  ;;  %728 = vst.msk [vmem:[%s1182_s27 + $0x1c] sm:$0xf] %vm720_vm2, %v940_v14  ;;  %v954_v20 = vpack.c.bf16 %v581_v15, %v581_v15  ;;  %v474_v21 = vadd.f32 %v994_v19, %v1170_v18  ;;  %v1010_v22 = vpop.f32.mrb[8].mxu1  ;;  %v465_v23 = vpop.f32.mrb[9].mxu0 }
  0xf8   : > { %744 = vst.msk [vmem:[%s1182_s27 + $0x5c] sm:$0xf] %vm720_vm2, %v956_v16  ;;  %726 = vst.msk [vmem:[%s1182_s27 + $0x14] sm:$0xf] %vm720_vm2, %v938_v17  ;;  %v538_v24 = vadd.f32 %v1010_v22, %v1170_v18  ;;  %v466_v25 = vadd.f32 %v1170_v18, %v465_v23  ;;  %v529_v26 = vpop.f32.mrb[9].mxu1  ;;  %v995_v27 = vpop.f32.mrb[10].mxu0 }
  0xf9   : > { %742 = vst.msk [vmem:[%s1182_s27 + $0x54] sm:$0xf] %vm720_vm2, %v954_v20  ;;  %v570_v28 = vmax.f32 %v474_v21, 0.0  ;;  %v530_v29 = vadd.f32 %v1170_v18, %v529_v26  ;;  %v477_v30 = vadd.f32 %v995_v27, %v1170_v18  ;;  %v1011_v31 = vpop.f32.mrb[10].mxu1  ;;  %v468_v32 = vpop.f32.mrb[11].mxu0 }
  0xfa   : > { %v586_v33 = vmax.f32 %v538_v24, 0.0  ;;  %v568_v34 = vmax.f32 %v466_v25, 0.0  ;;  %v541_v35 = vadd.f32 %v1011_v31, %v1170_v18  ;;  %v469_v36 = vadd.f32 %v1170_v18, %v468_v32  ;;  %v532_v37 = vpop.f32.mrb[11].mxu1 }
  0xfb   : > { %v943_v38 = vpack.c.bf16 %v570_v28, %v570_v28  ;;  %v584_v39 = vmax.f32 %v530_v29, 0.0  ;;  %v571_v40 = vmax.f32 %v477_v30, 0.0  ;;  %v533_v41 = vadd.f32 %v1170_v18, %v532_v37 }
  0xfc   : > { %v959_v42 = vpack.c.bf16 %v586_v33, %v586_v33  ;;  %v941_v43 = vpack.c.bf16 %v568_v34, %v568_v34  ;;  %v587_v44 = vmax.f32 %v541_v35, 0.0  ;;  %v569_v45 = vmax.f32 %v469_v36, 0.0 }
  0xfd   : > { %731 = vst.msk [vmem:[%s1182_s27 + $0x28] sm:$0xf] %vm720_vm2, %v943_v38  ;;  %v957_v46 = vpack.c.bf16 %v584_v39, %v584_v39  ;;  %v944_v47 = vpack.c.bf16 %v571_v40, %v571_v40  ;;  %v585_v48 = vmax.f32 %v533_v41, 0.0 }
  0xfe   : > { %747 = vst.msk [vmem:[%s1182_s27 + $0x68] sm:$0xf] %vm720_vm2, %v959_v42  ;;  %729 = vst.msk [vmem:[%s1182_s27 + $0x20] sm:$0xf] %vm720_vm2, %v941_v43  ;;  %v960_v49 = vpack.c.bf16 %v587_v44, %v587_v44  ;;  %v942_v50 = vpack.c.bf16 %v569_v45, %v569_v45  ;;  %v998_v51 = vpop.f32.mrb[12].mxu0 }
  0xff   : > { %745 = vst.msk [vmem:[%s1182_s27 + $0x60] sm:$0xf] %vm720_vm2, %v957_v46  ;;  %732 = vst.msk [vmem:[%s1182_s27 + $0x2c] sm:$0xf] %vm720_vm2, %v944_v47  ;;  %v958_v52 = vpack.c.bf16 %v585_v48, %v585_v48  ;;  %v490_v53 = vadd.f32 %v998_v51, %v1170_v18  ;;  %v1014_v54 = vpop.f32.mrb[12].mxu1  ;;  %v481_v55 = vpop.f32.mrb[13].mxu0 }
 0x100   : > { %748 = vst.msk [vmem:[%s1182_s27 + $0x6c] sm:$0xf] %vm720_vm2, %v960_v49  ;;  %730 = vst.msk [vmem:[%s1182_s27 + $0x24] sm:$0xf] %vm720_vm2, %v942_v50  ;;  %v554_v56 = vadd.f32 %v1014_v54, %v1170_v18  ;;  %v482_v57 = vadd.f32 %v1170_v18, %v481_v55  ;;  %v545_v58 = vpop.f32.mrb[13].mxu1  ;;  %v999_v59 = vpop.f32.mrb[14].mxu0 }
 0x101   : > { %746 = vst.msk [vmem:[%s1182_s27 + $0x64] sm:$0xf] %vm720_vm2, %v958_v52  ;;  %v574_v60 = vmax.f32 %v490_v53, 0.0  ;;  %v546_v61 = vadd.f32 %v1170_v18, %v545_v58  ;;  %v493_v62 = vadd.f32 %v999_v59, %v1170_v18  ;;  %v1015_v63 = vpop.f32.mrb[14].mxu1  ;;  %v484_v0 = vpop.f32.mrb[15].mxu0 }
 0x102   : > { %v590_v1 = vmax.f32 %v554_v56, 0.0  ;;  %v572_v2 = vmax.f32 %v482_v57, 0.0  ;;  %v557_v3 = vadd.f32 %v1015_v63, %v1170_v18  ;;  %v485_v4 = vadd.f32 %v1170_v18, %v484_v0  ;;  %v548_v5 = vpop.f32.mrb[15].mxu1 }
 0x103   : > { %v947_v6 = vpack.c.bf16 %v574_v60, %v574_v60  ;;  %v588_v7 = vmax.f32 %v546_v61, 0.0  ;;  %v575_v8 = vmax.f32 %v493_v62, 0.0  ;;  %v549_v9 = vadd.f32 %v1170_v18, %v548_v5 }
 0x104   : > { %v963_v10 = vpack.c.bf16 %v590_v1, %v590_v1  ;;  %v945_v11 = vpack.c.bf16 %v572_v2, %v572_v2  ;;  %v591_v12 = vmax.f32 %v557_v3, 0.0  ;;  %v573_v13 = vmax.f32 %v485_v4, 0.0 }
 0x105   : > { %735 = vst.msk [vmem:[%s1182_s27 + $0x38] sm:$0xf] %vm720_vm2, %v947_v6  ;;  %v961_v14 = vpack.c.bf16 %v588_v7, %v588_v7  ;;  %v948_v15 = vpack.c.bf16 %v575_v8, %v575_v8  ;;  %v589_v16 = vmax.f32 %v549_v9, 0.0 }
 0x106   : > { %751 = vst.msk [vmem:[%s1182_s27 + $0x78] sm:$0xf] %vm720_vm2, %v963_v10  ;;  %733 = vst.msk [vmem:[%s1182_s27 + $0x30] sm:$0xf] %vm720_vm2, %v945_v11  ;;  %v964_v17 = vpack.c.bf16 %v591_v12, %v591_v12  ;;  %v946_v19 = vpack.c.bf16 %v573_v13, %v573_v13 }
 0x107   : > { %749 = vst.msk [vmem:[%s1182_s27 + $0x70] sm:$0xf] %vm720_vm2, %v961_v14  ;;  %736 = vst.msk [vmem:[%s1182_s27 + $0x3c] sm:$0xf] %vm720_vm2, %v948_v15  ;;  %v962_v18 = vpack.c.bf16 %v589_v16, %v589_v16 }
 0x108   : > { %752 = vst.msk [vmem:[%s1182_s27 + $0x7c] sm:$0xf] %vm720_vm2, %v964_v17  ;;  %734 = vst.msk [vmem:[%s1182_s27 + $0x34] sm:$0xf] %vm720_vm2, %v946_v19 }
 0x109   : > { %750 = vst.msk [vmem:[%s1182_s27 + $0x74] sm:$0xf] %vm720_vm2, %v962_v18 }
 0x10a PF: > { %s13_s14 = sadd.s32 1, %s1082_s14   ;;  %s1288_s12 = smov %s1078_s13 }
 0x10b   : > { %p10_p5 = scmp.ge.s32.totalorder %s13_s14, 4   ;;  %s1289_s13 = smov %s1291_s15 }
 0x10d   :  { %12 = sbr.rel (!%p10_p5) target bundleno = 2 (0x2), region = 68 }

</bundles_post_ra>
